<compile_context>
chip_gen: v6e
topology: v6e:2x2x1
jax: 0.10.0
libtpu: 0.0.40
codegen_flags: <defaults>
</compile_context>

<pallas_src>
import jax
import jax.numpy as jnp
from jax.experimental import pallas as pl
from jax.experimental.pallas import tpu as pltpu


def _round_up(x, m):
    return ((x + m - 1) // m) * m


def _relu_epilogue(z):
    return jnp.maximum(z, 0.0)


def _make_log_softmax_epilogue(num_classes):
    def epilogue(z):
        col = jax.lax.broadcasted_iota(jnp.int32, z.shape, 1)
        valid = col < num_classes
        z = jnp.where(valid, z, -jnp.inf)
        m = jnp.max(z, axis=-1, keepdims=True)
        zz = z - m
        lse = jnp.log(jnp.sum(jnp.exp(zz), axis=-1, keepdims=True))
        return jnp.where(valid, zz - lse, 0.0)
    return epilogue


# --------------------------------------------------------------------------
# Reassociated layer kernel: out = epilogue( A @ (x@Wl) + x_i @ Wr + b )
# acc (tm, feat_out) f32 is initialized at k==0 with the hoisted self term.
# --------------------------------------------------------------------------
def make_pre_agg_kernel(epilogue):
    def kernel(a_ref, xwk_ref, xi_ref, wr_ref, b_ref, out_ref, acc_ref):
        k = pl.program_id(1)

        @pl.when(k == 0)
        def _():
            acc_ref[...] = (jnp.dot(xi_ref[...], wr_ref[...],
                                    preferred_element_type=jnp.float32)
                            + b_ref[...])

        acc_ref[...] += jnp.dot(a_ref[...], xwk_ref[...],
                                preferred_element_type=jnp.float32)

        @pl.when(k == pl.num_programs(1) - 1)
        def _():
            out_ref[...] = epilogue(acc_ref[...]).astype(out_ref.dtype)

    return kernel


# --------------------------------------------------------------------------
# Generic layer kernel: out = epilogue( (A @ x) @ Wl + x_i @ Wr + b )
# acc (tm, feat_in) f32 accumulates A@x; self (tm, feat_out) f32 holds the
# hoisted self term computed at k==0 (overlaps the A-stream instead of
# serializing in the epilogue).
# --------------------------------------------------------------------------
def make_agg_affine_kernel(epilogue):
    def kernel(a_ref, xk_ref, xi_ref, wl_ref, wr_ref, b_ref, out_ref,
               acc_ref, self_ref):
        k = pl.program_id(1)

        @pl.when(k == 0)
        def _():
            acc_ref[...] = jnp.zeros_like(acc_ref)
            self_ref[...] = (jnp.dot(xi_ref[...], wr_ref[...],
                                     preferred_element_type=jnp.float32)
                             + b_ref[...])

        acc_ref[...] += jnp.dot(a_ref[...], xk_ref[...],
                                preferred_element_type=jnp.float32)

        @pl.when(k == pl.num_programs(1) - 1)
        def _():
            agg = acc_ref[...].astype(jnp.bfloat16)
            z = (jnp.dot(agg, wl_ref[...], preferred_element_type=jnp.float32)
                 + self_ref[...])
            out_ref[...] = epilogue(z).astype(out_ref.dtype)

    return kernel


def sage_forward(node_ids, edge_index, mask_x_position, params, *, tm=256, tk=256):
    """Embedding lookup, adjacency build and mask-row gather in the XLA wrapper;
    the two SAGE layers run as Pallas kernels (layer 2 only on masked rows)."""
    emb = params["emb"]
    N = node_ids.shape[0]
    D = emb.shape[1]
    H = params["wl1"].shape[1]
    C = params["wl2"].shape[1]
    M = mask_x_position.shape[0]

    f32, bf16 = jnp.float32, jnp.bfloat16

    # Zero-pad to lane/tile friendly sizes (keeps results exact).
    Np = _round_up(max(N, 1), max(tm, tk))
    Dp = _round_up(D, 128)
    Hp = _round_up(H, 128)
    Cp = _round_up(C, 128)
    Mp = _round_up(max(M, 1), 8)
    if Mp > tm:
        Mp = _round_up(Mp, tm)
        tmm = tm
    else:
        tmm = Mp

    # Embedding lookup + squeeze(1); dropout is identity in eval mode.
    x = emb[node_ids.reshape(N)]
    x_p = jnp.zeros((Np, Dp), f32).at[:N, :D].set(x).astype(bf16)

    # Row-normalized dense adjacency built cheaply: 1-D degree segment-sum, then a
    # single scatter of 1/deg directly into bf16 (matches PyG mean aggregation,
    # duplicate edges weighted, isolated-node rows stay zero).
    # TODO(synk): for large graphs replace the dense A (O(N^2)) with CSR neighbor
    # lists + PrefetchScalarGridSpec gather-based sparse mean aggregation.
    src, dst = edge_index[0], edge_index[1]
    deg = jnp.zeros((Np,), f32).at[dst].add(1.0)
    inv_deg = 1.0 / jnp.maximum(deg, 1.0)
    A = jnp.zeros((Np, Np), bf16).at[dst, src].add(inv_deg[dst].astype(bf16))

    def pad2(w, r, c, dtype):
        return (jnp.zeros((r, c), f32)
                .at[:w.shape[0], :w.shape[1]].set(w).astype(dtype))

    wl1 = pad2(params["wl1"], Dp, Hp, bf16)
    wr1 = pad2(params["wr1"], Dp, Hp, bf16)
    b1 = pad2(params["b1"], 1, Hp, f32)
    wl2 = pad2(params["wl2"], Hp, Cp, bf16)
    wr2 = pad2(params["wr2"], Hp, Cp, bf16)
    b2 = pad2(params["b2"], 1, Cp, f32)

    compiler_params = pltpu.CompilerParams(
        dimension_semantics=("parallel", "arbitrary"),
        vmem_limit_bytes=64 * 1024 * 1024)

    # ------------------ Layer 1: h = relu(SAGEConv1(x)) over all rows ------------
    grid1 = (Np // tm, Np // tk)
    if Hp <= Dp:
        # Reassociated form A@(x@Wl1): xWl precomputed once in the wrapper (small
        # dense matmul), kernel streams a slab no wider than x and needs no
        # epilogue matmul / bf16 accumulator round-trip.
        xwl = jnp.dot(x_p, wl1, preferred_element_type=f32).astype(bf16)
        h = pl.pallas_call(
            make_pre_agg_kernel(_relu_epilogue),
            out_shape=jax.ShapeDtypeStruct((Np, Hp), bf16),
            grid_spec=pltpu.PrefetchScalarGridSpec(
                num_scalar_prefetch=0,
                grid=grid1,
                in_specs=[
                    pl.BlockSpec((tm, tk), lambda i, k: (i, k)),   # A tile
                    pl.BlockSpec((tk, Hp), lambda i, k: (k, 0)),   # (x@Wl1) rows
                    pl.BlockSpec((tm, Dp), lambda i, k: (i, 0)),   # self rows
                    pl.BlockSpec((Dp, Hp), lambda i, k: (0, 0)),   # Wr1
                    pl.BlockSpec((1, Hp), lambda i, k: (0, 0)),    # b1
                ],
                out_specs=pl.BlockSpec((tm, Hp), lambda i, k: (i, 0)),
                scratch_shapes=[pltpu.VMEM((tm, Hp), jnp.float32)],
            ),
            compiler_params=compiler_params,
        )(A, xwl, x_p, wr1, b1)
    else:
        h = pl.pallas_call(
            make_agg_affine_kernel(_relu_epilogue),
            out_shape=jax.ShapeDtypeStruct((Np, Hp), bf16),
            grid_spec=pltpu.PrefetchScalarGridSpec(
                num_scalar_prefetch=0,
                grid=grid1,
                in_specs=[
                    pl.BlockSpec((tm, tk), lambda i, k: (i, k)),
                    pl.BlockSpec((tk, Dp), lambda i, k: (k, 0)),
                    pl.BlockSpec((tm, Dp), lambda i, k: (i, 0)),
                    pl.BlockSpec((Dp, Hp), lambda i, k: (0, 0)),
                    pl.BlockSpec((Dp, Hp), lambda i, k: (0, 0)),
                    pl.BlockSpec((1, Hp), lambda i, k: (0, 0)),
                ],
                out_specs=pl.BlockSpec((tm, Hp), lambda i, k: (i, 0)),
                scratch_shapes=[pltpu.VMEM((tm, Dp), jnp.float32),
                                pltpu.VMEM((tm, Hp), jnp.float32)],
            ),
            compiler_params=compiler_params,
        )(A, x_p, x_p, wl1, wr1, b1)

    # Padded rows of h equal relu(b1); safe because A's padded columns are zero
    # and layer 2 only reads masked (real) self rows.

    # -------- Layer 2: log_softmax(SAGEConv2(h))[mask] — masked rows only --------
    mask_pad = jnp.zeros((Mp,), jnp.int32).at[:M].set(
        mask_x_position.astype(jnp.int32))
    A_m = A[mask_pad]                      # (Mp, Np) bf16
    h_m = h[mask_pad]                      # (Mp, Hp) bf16

    grid2 = (Mp // tmm, Np // tk)
    # TODO(synk): for very large node_dict_size, tile Cp with a third grid axis +
    # online log-softmax and single-buffer the invariant Wl2/Wr2/b2 blocks
    # (pipeline_mode=pl.Buffered(1)) to stay inside v7x's 64 MiB VMEM.
    log_probs = pl.pallas_call(
        make_agg_affine_kernel(_make_log_softmax_epilogue(C)),
        out_shape=jax.ShapeDtypeStruct((Mp, Cp), jnp.float32),
        grid_spec=pltpu.PrefetchScalarGridSpec(
            num_scalar_prefetch=0,
            grid=grid2,
            in_specs=[
                pl.BlockSpec((tmm, tk), lambda i, k: (i, k)),   # A rows of masked nodes
                pl.BlockSpec((tk, Hp), lambda i, k: (k, 0)),    # h neighbor rows
                pl.BlockSpec((tmm, Hp), lambda i, k: (i, 0)),   # h self rows (masked)
                pl.BlockSpec((Hp, Cp), lambda i, k: (0, 0)),    # Wl2
                pl.BlockSpec((Hp, Cp), lambda i, k: (0, 0)),    # Wr2
                pl.BlockSpec((1, Cp), lambda i, k: (0, 0)),     # b2
            ],
            out_specs=pl.BlockSpec((tmm, Cp), lambda i, k: (i, 0)),
            scratch_shapes=[pltpu.VMEM((tmm, Hp), jnp.float32),
                            pltpu.VMEM((tmm, Cp), jnp.float32)],
        ),
        compiler_params=compiler_params,
    )(A_m, h, h_m, wl2, wr2, b2)

    # Drop padded mask rows and padded class columns.
    return log_probs[:M, :C]


def init_params(key, node_dict_size, node_dim, hidden_dim):
    k = jax.random.split(key, 7)
    # Embedding: normal(0, node_dim ** -0.5)  (matches initialize_parameters)
    emb = jax.random.normal(k[0], (node_dict_size, node_dim),
                            jnp.float32) * node_dim ** (-0.5)
    # SAGEConv lin_l (with bias) and lin_r (no bias); stored as (in, out).
    s1 = node_dim ** (-0.5)
    s2 = hidden_dim ** (-0.5)
    wl1 = jax.random.uniform(k[1], (node_dim, hidden_dim), jnp.float32, -s1, s1)
    wr1 = jax.random.uniform(k[2], (node_dim, hidden_dim), jnp.float32, -s1, s1)
    b1 = jax.random.uniform(k[3], (1, hidden_dim), jnp.float32, -s1, s1)
    wl2 = jax.random.uniform(k[4], (hidden_dim, node_dict_size), jnp.float32, -s2, s2)
    wr2 = jax.random.uniform(k[5], (hidden_dim, node_dict_size), jnp.float32, -s2, s2)
    b2 = jax.random.uniform(k[6], (1, node_dict_size), jnp.float32, -s2, s2)
    return dict(emb=emb, wl1=wl1, b1=b1, wr1=wr1, wl2=wl2, b2=b2, wr2=wr2)


if __name__ == "__main__":
    node_dict_size = 32
    node_dim = 16
    hidden_dim = 32
    num_nodes = 12
    num_edges = 24
    # dropout p=0.1 but training=False -> identity (eval-mode forward).

    key = jax.random.PRNGKey(0)
    kp, kn, ke = jax.random.split(key, 3)

    params = init_params(kp, node_dict_size, node_dim, hidden_dim)

    # Node ids: (N, 1) like the PyTorch module (then squeeze(1)).
    node_ids = jax.random.randint(kn, (num_nodes, 1), 0, node_dict_size, jnp.int32)
    edge_index = jax.random.randint(ke, (2, num_edges), 0, num_nodes, jnp.int32)
    mask_x_position = jnp.array([0, 3, 7], dtype=jnp.int32)

    out = sage_forward(node_ids, edge_index, mask_x_position, params)
    jax.block_until_ready(out)

    assert out.shape == (mask_x_position.shape[0], node_dict_size)
    assert bool(jnp.all(jnp.isfinite(out)))
    # Sanity: log_softmax rows must sum to ~1 in prob space.
    row_sums = jnp.sum(jnp.exp(out), axis=1)
    assert bool(jnp.all(jnp.abs(row_sums - 1.0) < 1e-4))

    # Pure-JAX f32 reference (bf16 MXU inputs give ~1e-2 absolute deviation).
    x_ref = params["emb"][node_ids.reshape(-1)]
    A_ref = jnp.zeros((num_nodes, num_nodes), jnp.float32).at[
        edge_index[1], edge_index[0]].add(1.0)
    A_ref = A_ref / jnp.maximum(A_ref.sum(axis=1, keepdims=True), 1.0)
    h_ref = jnp.maximum(
        A_ref @ x_ref @ params["wl1"] + x_ref @ params["wr1"] + params["b1"], 0.0)
    o_ref = (A_ref @ h_ref @ params["wl2"] + h_ref @ params["wr2"]
             + params["b2"])[mask_x_position]
    lp_ref = o_ref - jax.scipy.special.logsumexp(o_ref, axis=1, keepdims=True)
    max_err = float(jnp.max(jnp.abs(out - lp_ref)))
    assert max_err < 1e-1, f"max |log_prob - ref| = {max_err}"

    print("KERNEL_OK")
</pallas_src>

<mosaic_0001>
module attributes {stable_mosaic.version = 11 : i64} {
  func.func @kernel(%arg0: i32, %arg1: i32, %arg2: memref<256x256xbf16, #tpu.memory_space<vmem>>, %arg3: memref<256x128xbf16, #tpu.memory_space<vmem>>, %arg4: memref<256x128xbf16, #tpu.memory_space<vmem>>, %arg5: memref<128x128xbf16, #tpu.memory_space<vmem>>, %arg6: memref<1x128xf32, #tpu.memory_space<vmem>>, %arg7: memref<256x128xbf16, #tpu.memory_space<vmem>>, %arg8: memref<256x128xf32, #tpu.memory_space<vmem>>) attributes {dimension_semantics = [#tpu.dimension_semantics<parallel>, #tpu.dimension_semantics<arbitrary>], iteration_bounds = array<i64: 1, 1>, scalar_prefetch = 0 : i64, scratch_operands = 1 : i64, tpu.core_type = #tpu.core_type<tc>, window_params = [{transform_indices = @transform_0, window_bounds = array<i64: 256, 256>}, {transform_indices = @transform_1, window_bounds = array<i64: 256, 128>}, {transform_indices = @transform_2, window_bounds = array<i64: 256, 128>}, {pipeline_mode = #tpu.pipeline_mode<synchronous>, transform_indices = @transform_3, window_bounds = array<i64: 128, 128>}, {pipeline_mode = #tpu.pipeline_mode<synchronous>, transform_indices = @transform_4, window_bounds = array<i64: 1, 128>}, {transform_indices = @transform_5, window_bounds = array<i64: 256, 128>}]} {
    %c0_i32 = arith.constant 0 : i32
    %0 = arith.cmpi eq, %arg1, %c0_i32 : i32
    %1 = arith.extui %0 : i1 to i32
    %c0_i32_0 = arith.constant 0 : i32
    %2 = arith.cmpi ne, %1, %c0_i32_0 : i32
    scf.if %2 {
      %c0_10 = arith.constant 0 : index
      %c0_11 = arith.constant 0 : index
      %12 = vector.load %arg4[%c0_10, %c0_11] : memref<256x128xbf16, #tpu.memory_space<vmem>>, vector<256x128xbf16>
      %c0_12 = arith.constant 0 : index
      %c0_13 = arith.constant 0 : index
      %13 = vector.load %arg5[%c0_12, %c0_13] : memref<128x128xbf16, #tpu.memory_space<vmem>>, vector<128x128xbf16>
      %cst_14 = arith.constant dense<0.000000e+00> : vector<256x128xf32>
      %14 = tpu.matmul %12, %13, %cst_14 {dimension_numbers = #tpu.dot_dimension_numbers<[1], [0], [0], [1], [0, 0, 1, 1], [], []>} : vector<256x128xbf16>, vector<128x128xbf16>, vector<256x128xf32> -> vector<256x128xf32>
      %c0_15 = arith.constant 0 : index
      %c0_16 = arith.constant 0 : index
      %15 = vector.load %arg6[%c0_15, %c0_16] : memref<1x128xf32, #tpu.memory_space<vmem>>, vector<1x128xf32>
      %16 = vector.broadcast %15 : vector<1x128xf32> to vector<256x128xf32>
      %17 = arith.addf %14, %16 : vector<256x128xf32>
      %c0_17 = arith.constant 0 : index
      %c0_18 = arith.constant 0 : index
      %18 = vector.load %arg8[%c0_17, %c0_18] : memref<256x128xf32, #tpu.memory_space<vmem>>, vector<256x128xf32>
      tpu.vector_store %arg8[%c0_17, %c0_18], %17 {strides = array<i32>} : memref<256x128xf32, #tpu.memory_space<vmem>>, vector<256x128xf32>,
    } else {
    }
    %c0 = arith.constant 0 : index
    %c0_1 = arith.constant 0 : index
    %3 = vector.load %arg8[%c0, %c0_1] : memref<256x128xf32, #tpu.memory_space<vmem>>, vector<256x128xf32>
    %c0_2 = arith.constant 0 : index
    %c0_3 = arith.constant 0 : index
    %4 = vector.load %arg2[%c0_2, %c0_3] : memref<256x256xbf16, #tpu.memory_space<vmem>>, vector<256x256xbf16>
    %c0_4 = arith.constant 0 : index
    %c0_5 = arith.constant 0 : index
    %5 = vector.load %arg3[%c0_4, %c0_5] : memref<256x128xbf16, #tpu.memory_space<vmem>>, vector<256x128xbf16>
    %cst = arith.constant dense<0.000000e+00> : vector<256x128xf32>
    %6 = tpu.matmul %4, %5, %cst {dimension_numbers = #tpu.dot_dimension_numbers<[1], [0], [0], [1], [0, 0, 1, 1], [], []>} : vector<256x256xbf16>, vector<256x128xbf16>, vector<256x128xf32> -> vector<256x128xf32>
    %7 = arith.addf %3, %6 : vector<256x128xf32>
    %c0_6 = arith.constant 0 : index
    %c0_7 = arith.constant 0 : index
    %8 = vector.load %arg8[%c0_6, %c0_7] : memref<256x128xf32, #tpu.memory_space<vmem>>, vector<256x128xf32>
    tpu.vector_store %arg8[%c0_6, %c0_7], %7 {strides = array<i32>} : memref<256x128xf32, #tpu.memory_space<vmem>>, vector<256x128xf32>,
    %c0_i32_8 = arith.constant 0 : i32
    %9 = arith.cmpi eq, %arg1, %c0_i32_8 : i32
    %10 = arith.extui %9 : i1 to i32
    %c0_i32_9 = arith.constant 0 : i32
    %11 = arith.cmpi ne, %10, %c0_i32_9 : i32
    scf.if %11 {
      %c0_10 = arith.constant 0 : index
      %c0_11 = arith.constant 0 : index
      %12 = vector.load %arg8[%c0_10, %c0_11] : memref<256x128xf32, #tpu.memory_space<vmem>>, vector<256x128xf32>
      %cst_12 = arith.constant 0.000000e+00 : f32
      %13 = vector.broadcast %cst_12 : f32 to vector<256x128xf32>
      %14 = arith.maximumf %12, %13 : vector<256x128xf32>
      %15 = arith.truncf %14 : vector<256x128xf32> to vector<256x128xbf16>
      %c0_13 = arith.constant 0 : index
      %c0_14 = arith.constant 0 : index
      %16 = vector.load %arg7[%c0_13, %c0_14] : memref<256x128xbf16, #tpu.memory_space<vmem>>, vector<256x128xbf16>
      tpu.vector_store %arg7[%c0_13, %c0_14], %15 {strides = array<i32>} : memref<256x128xbf16, #tpu.memory_space<vmem>>, vector<256x128xbf16>,
    } else {
    }
    return
  }
  func.func @transform_0(%arg0: i32, %arg1: i32) -> (i32, i32) {
    %c0_i32 = arith.constant 0 : i32
    return %arg0, %arg1 : i32, i32
  }
  func.func @transform_1(%arg0: i32, %arg1: i32) -> (i32, i32) {
    %c0_i32 = arith.constant 0 : i32
    %c0_i32_0 = arith.constant 0 : i32
    return %arg1, %c0_i32 : i32, i32
  }
  func.func @transform_2(%arg0: i32, %arg1: i32) -> (i32, i32) {
    %c0_i32 = arith.constant 0 : i32
    %c0_i32_0 = arith.constant 0 : i32
    return %arg0, %c0_i32 : i32, i32
  }
  func.func @transform_3(%arg0: i32, %arg1: i32) -> (i32, i32) {
    %c0_i32 = arith.constant 0 : i32
    %c0_i32_0 = arith.constant 0 : i32
    %c0_i32_1 = arith.constant 0 : i32
    return %c0_i32, %c0_i32_0 : i32, i32
  }
  func.func @transform_4(%arg0: i32, %arg1: i32) -> (i32, i32) {
    %c0_i32 = arith.constant 0 : i32
    %c0_i32_0 = arith.constant 0 : i32
    %c0_i32_1 = arith.constant 0 : i32
    return %c0_i32, %c0_i32_0 : i32, i32
  }
  func.func @transform_5(%arg0: i32, %arg1: i32) -> (i32, i32) {
    %c0_i32 = arith.constant 0 : i32
    %c0_i32_0 = arith.constant 0 : i32
    return %arg0, %c0_i32 : i32, i32
  }
}

</mosaic_0001>

<bundles_post_ra>
// kernel: tpu_custom_call.1
= control target key start
LH: loop header
LB: loop body
LE: loop exit
PB: predicated region body
PF: predicated region fallthrough
CT: control target
= control target key end

     0   :  { %10 = vsyncpa [#allocation4], 0  ;;  %s2094_s0 = inlined_call_operand.hbm [shape: bf16[256,256], index: 0, kind: input, shape index: {}]   ;;  %s2095_s1 = inlined_call_operand.hbm [shape: bf16[256,128], index: 1, kind: input, shape index: {}]   ;;  %s2096_s2 = inlined_call_operand.hbm [shape: bf16[256,128], index: 2, kind: input, shape index: {}]   ;;  %s2097_s3 = inlined_call_operand.hbm [shape: bf16[128,128], index: 3, kind: input, shape index: {}]   ;;  %s2098_s4 = inlined_call_operand.vmem [shape: f32[1,128], index: 4, kind: input, shape index: {}]   ;;  %s2099_s5 = inlined_call_operand.hbm [shape: bf16[256,128], index: 5, kind: output, shape index: {}]  }
   0x1   :  { %11 = vsyncpa [#allocation7], 0 }
   0x2   :  { %12 = vsyncpa [#allocation10], 0 }
   0x3   :  { %13 = vsyncpa [#allocation5], 0  ;;  %s1933_s18 = smov [#allocation6]  }
   0x4   :  { %s31_s19 = sshll.u32 %s1933_s18, 4  ;;  %s32_s19 = int_to_ptr.vmem [resolvable:$true] %s31_s19 }
   0x5   :  { %s1833_s20 = scalar_lea.vmem %s32_s19, 2048  ;;  %p1838_p1 = scmp.lt.s32.totalorder %s32_s19, %s32_s19 }
   0x6   :  { %p1834_p0 = scmp.ne.s32.totalorder %s32_s19, %s1833_s20  ;;  %p1839_p2 = scmp.lt.s32.totalorder %s1833_s20, %s1833_s20 }
   0x8   :  { %p1840_p3 = por %p1839_p2, %p1838_p1 }
   0xa   :  { %p1841_p4 = pnand %p1840_p3, %p1834_p0 }
   0xc   :  { %1844 = shalt.err (!%p1841_p4)
}
   0xd   :  { %s1934_s21 = smov 64   ;;  %s1935_s22 = smov 4  }
   0xe   :  { %37 = dma.hbm_to_vmem [thread:$0]  %s2095_s1, 2048, %s32_s19, [#allocation7], %s1934_s21, %s1934_s21, %s1935_s22  }
   0xf   :  { %s1936_s25 = smov [#allocation3]  }
  0x10   :  { %s19_s26 = sshll.u32 %s1936_s25, 4  ;;  %s20_s26 = int_to_ptr.vmem [resolvable:$true] %s19_s26 }
  0x11   :  { %s1853_s27 = scalar_lea.vmem %s20_s26, 4096  ;;  %p1858_p6 = scmp.lt.s32.totalorder %s20_s26, %s20_s26 }
  0x12   :  { %p1854_p5 = scmp.ne.s32.totalorder %s20_s26, %s1853_s27  ;;  %p1859_p7 = scmp.lt.s32.totalorder %s1853_s27, %s1853_s27 }
  0x14   :  { %p1860_p8 = por %p1859_p7, %p1858_p6 }
  0x16   :  { %p1861_p9 = pnand %p1860_p8, %p1854_p5 }
  0x18   :  { %1864 = shalt.err (!%p1861_p9)
}
  0x19   :  { %s1937_s28 = smov 128   ;;  %s1938_s29 = smov 8  }
  0x1a   :  { %25 = dma.hbm_to_vmem [thread:$0]  %s2094_s0, 4096, %s20_s26, [#allocation4], %s1937_s28, %s1937_s28, %s1938_s29  }
  0x1b   :  { %s1939_s7 = smov [#allocation8]   ;;  %s1940_s9 = smov [#allocation9]  }
  0x1c   :  { %s43_s8 = sshll.u32 %s1939_s7, 4  ;;  %s55_s1 = sshll.u32 %s1940_s9, 4  ;;  %s44_s8 = int_to_ptr.vmem [resolvable:$true] %s43_s8  ;;  %s56_s1 = int_to_ptr.vmem [resolvable:$true] %s55_s1 }
  0x1d   :  { %s1873_s10 = scalar_lea.vmem %s44_s8, 2048  ;;  %p1878_p11 = scmp.lt.s32.totalorder %s44_s8, %s44_s8 }
  0x1e   :  { %p1874_p10 = scmp.ne.s32.totalorder %s44_s8, %s1873_s10  ;;  %p1879_p12 = scmp.lt.s32.totalorder %s1873_s10, %s1873_s10 }
  0x20   :  { %p1880_p13 = por %p1879_p12, %p1878_p11 }
  0x22   :  { %p1881_p0 = pnand %p1880_p13, %p1874_p10 }
  0x24   :  { %1884 = shalt.err (!%p1881_p0)
}
  0x25   :  { %49 = dma.hbm_to_vmem [thread:$0]  %s2096_s2, 2048, %s44_s8, [#allocation7], %s1934_s21, %s1934_s21, %s1935_s22  }
  0x26   :  { %s1893_s0 = scalar_lea.vmem %s56_s1, 1024  ;;  %p1898_p2 = scmp.lt.s32.totalorder %s56_s1, %s56_s1 }
  0x27   :  { %p1894_p1 = scmp.ne.s32.totalorder %s56_s1, %s1893_s0  ;;  %p1899_p3 = scmp.lt.s32.totalorder %s1893_s0, %s1893_s0 }
  0x29   :  { %p1900_p4 = por %p1899_p3, %p1898_p2 }
  0x2b   :  { %p1901_p5 = pnand %p1900_p4, %p1894_p1 }
  0x2d   :  { %1904 = shalt.err (!%p1901_p5)
}
  0x2e   :  { %61 = dma.hbm_to_vmem [thread:$0]  %s2097_s3, 1024, %s56_s1, [#allocation10], %s1934_s21, %s1934_s21, %s1935_s22  }
  0x2f   :  { %1925 = dma.done.wait [#allocation4], 4096  }
  0x30   :  { %1926 = vsyncadd [#allocation4], 4294963200 }
  0x31   :  { %1927 = dma.done.wait [#allocation7], 4096  }
  0x32   :  { %1928 = vsyncadd [#allocation7], 4294963200 }
  0x33   :  { %1929 = dma.done.wait [#allocation10], 1024  }
  0x34   :  { %1930 = vsyncadd [#allocation10], 4294966272  ;;  %v1737_v0 = vld [vmem:[#allocation9 + $0x38] sm:$0xff]   ;;  %v1740_v3 = vld [vmem:[#allocation9 + $0x30] sm:$0xff]  }
  0x35   :  { %v1738_v1 = vld [vmem:[#allocation6 + $0x78] sm:$0xff]   ;;  %1664 = vmatprep.subr.bf16.mxu0 %v1737_v0  ;;  %v1741_v4 = vld [vmem:[#allocation6 + $0x70] sm:$0xff]   ;;  %v1743_v6 = vld [vmem:[#allocation9 + $0x28] sm:$0xff]  }
  0x36   :  { %v1993_v2 = vld [vmem:[#allocation6 + $0x38] sm:$0xff]   ;;  %1712 = vmatprep.subr.bf16.mxu1 %v1738_v1  ;;  %1665 = vmatpush3.bf16.msra.mxu0 %v1737_v0  ;;  %v1742_v5 = vld [vmem:[#allocation6 + $0x30] sm:$0xff]   ;;  %v1744_v7 = vld [vmem:[#allocation6 + $0x68] sm:$0xff]  }
  0x37   :  { %1720 = vmatpush3.bf16.msra.mxu1 %v1993_v2  ;;  %1666 = vmatprep.subr.bf16.mxu0 %v1740_v3  ;;  %v1996_v8 = vld [vmem:[#allocation6 + $0x28] sm:$0xff]   ;;  %v1746_v9 = vld [vmem:[#allocation9 + $0x20] sm:$0xff]   ;;  %v1749_v12 = vld [vmem:[#allocation9 + $0x18] sm:$0xff]  }
  0x38   :  { %1713 = vmatprep.subr.bf16.mxu1 %v1741_v4  ;;  %v1747_v10 = vld [vmem:[#allocation6 + $0x60] sm:$0xff]   ;;  %v1750_v13 = vld [vmem:[#allocation6 + $0x58] sm:$0xff]   ;;  %v1752_v15 = vld [vmem:[#allocation9 + $0x10] sm:$0xff]  }
  0x39   :  { %v1998_v11 = vld [vmem:[#allocation6 + $0x20] sm:$0xff]   ;;  %v2001_v14 = vld [vmem:[#allocation6 + $0x18] sm:$0xff]   ;;  %v1753_v16 = vld [vmem:[#allocation6 + $0x50] sm:$0xff]  }
  0x3a   :  { %1667 = vmatpush3.bf16.msra.mxu0 %v1740_v3  ;;  %v1754_v17 = vld [vmem:[#allocation6 + $0x10] sm:$0xff]   ;;  %v1755_v18 = vld [vmem:[#allocation9 + $0x8] sm:$0xff]   ;;  %v1758_v21 = vld [vmem:[#allocation9] sm:$0xff]  }
  0x3b   :  { %1721 = vmatpush3.bf16.msra.mxu1 %v1742_v5  ;;  %1668 = vmatprep.subr.bf16.mxu0 %v1743_v6  ;;  %v1756_v19 = vld [vmem:[#allocation6 + $0x48] sm:$0xff]   ;;  %v1761_v22 = vld [vmem:[#allocation8] sm:$0xff]   ;;  %v1766_v28 = vld [vmem:[#allocation8 + $0x10] sm:$0xff]  }
  0x3c   :  { %1714 = vmatprep.subr.bf16.mxu1 %v1744_v7  ;;  %v1757_v20 = vld [vmem:[#allocation6 + $0x8] sm:$0xff]   ;;  %v1759_v23 = vld [vmem:[#allocation6 + $0x40] sm:$0xff]   ;;  %1680 = vmatprep.mubr.bf16.mxu0 %v1761_v22  ;;  %v1767_v29 = vld [vmem:[#allocation3 + $0x54] ss:$8 sps:$4 sm:$0xff]  }
  0x3d   :  { %v1764_v24 = vld [vmem:[#allocation3 + $0x44] ss:$8 sps:$4 sm:$0xff]   ;;  %v1762_v26 = vld [vmem:[#allocation3 + $0x40] ss:$8 sps:$4 sm:$0xff]   ;;  %v1769_v30 = vld [vmem:[#allocation8 + $0x18] sm:$0xff]  }
  0x3e   :  { %1669 = vmatpush3.bf16.msra.mxu0 %v1743_v6  ;;  %v1760_v25 = vld [vmem:[#allocation6] sm:$0xff]   ;;  %889 = vmatprep.mubr.bf16.mxu1 %v1764_v24  ;;  %v1765_v27 = vld [vmem:[#allocation8 + $0x8] sm:$0xff]   ;;  %v1770_v31 = vld [vmem:[#allocation3 + $0x50] ss:$8 sps:$4 sm:$0xff]  }
  0x3f   :  { %1722 = vmatpush3.bf16.msra.mxu1 %v1996_v8  ;;  %1670 = vmatprep.subr.bf16.mxu0 %v1746_v9  ;;  %v1771_v32 = vld [vmem:[#allocation8 + $0x20] sm:$0xff]   ;;  %v1774_v34 = vld [vmem:[#allocation8 + $0x28] sm:$0xff]   ;;  %v1776_v36 = vld [vmem:[#allocation8 + $0x30] sm:$0xff]  }
  0x40   :  { %1715 = vmatprep.subr.bf16.mxu1 %v1747_v10  ;;  %v1772_v33 = vld [vmem:[#allocation3 + $0x64] ss:$8 sps:$4 sm:$0xff]   ;;  %v1775_v35 = vld [vmem:[#allocation3 + $0x60] ss:$8 sps:$4 sm:$0xff]   ;;  %v1777_v37 = vld [vmem:[#allocation3 + $0x74] ss:$8 sps:$4 sm:$0xff]  }
  0x41   :  { %v1779_v38 = vld [vmem:[#allocation8 + $0x38] sm:$0xff]   ;;  %v1781_v40 = vld [vmem:[#allocation8 + $0x40] sm:$0xff]   ;;  %v1784_v42 = vld [vmem:[#allocation8 + $0x48] sm:$0xff]  }
  0x42   :  { %1671 = vmatpush3.bf16.msra.mxu0 %v1746_v9  ;;  %v1780_v39 = vld [vmem:[#allocation3 + $0x70] ss:$8 sps:$4 sm:$0xff]   ;;  %v1782_v41 = vld [vmem:[#allocation3 + $0x84] ss:$8 sps:$4 sm:$0xff]   ;;  %v1785_v43 = vld [vmem:[#allocation3 + $0x80] ss:$8 sps:$4 sm:$0xff]  }
  0x43   :  { %1723 = vmatpush3.bf16.msra.mxu1 %v1998_v11  ;;  %1672 = vmatprep.subr.bf16.mxu0 %v1749_v12  ;;  %v1786_v44 = vld [vmem:[#allocation8 + $0x50] sm:$0xff]   ;;  %v1789_v46 = vld [vmem:[#allocation8 + $0x58] sm:$0xff]   ;;  %v1791_v48 = vld [vmem:[#allocation8 + $0x60] sm:$0xff]  }
  0x44   :  { %1716 = vmatprep.subr.bf16.mxu1 %v1750_v13  ;;  %v1787_v45 = vld [vmem:[#allocation3 + $0x94] ss:$8 sps:$4 sm:$0xff]   ;;  %v1790_v47 = vld [vmem:[#allocation3 + $0x90] ss:$8 sps:$4 sm:$0xff]   ;;  %v1792_v49 = vld [vmem:[#allocation3 + $0xa4] ss:$8 sps:$4 sm:$0xff]  }
  0x45   :  { %v1794_v50 = vld [vmem:[#allocation8 + $0x68] sm:$0xff]   ;;  %v1796_v52 = vld [vmem:[#allocation8 + $0x70] sm:$0xff]   ;;  %v1799_v54 = vld [vmem:[#allocation8 + $0x78] sm:$0xff]  }
  0x46   :  { %1673 = vmatpush3.bf16.msra.mxu0 %v1749_v12  ;;  %v1795_v51 = vld [vmem:[#allocation3 + $0xa0] ss:$8 sps:$4 sm:$0xff]   ;;  %v1797_v53 = vld [vmem:[#allocation3 + $0xb4] ss:$8 sps:$4 sm:$0xff]   ;;  %v1800_v55 = vld [vmem:[#allocation3 + $0xb0] ss:$8 sps:$4 sm:$0xff]  }
  0x47   :  { %1724 = vmatpush3.bf16.msra.mxu1 %v2001_v14  ;;  %1674 = vmatprep.subr.bf16.mxu0 %v1752_v15  ;;  %v1803_v56 = vld [vmem:[#allocation3 + $0x4] ss:$8 sps:$4 sm:$0xff]   ;;  %v1801_v58 = vld [vmem:[#allocation3] ss:$8 sps:$4 sm:$0xff]   ;;  %v1807_v60 = vld [vmem:[#allocation3 + $0x14] ss:$8 sps:$4 sm:$0xff]  }
  0x48   :  { %1717 = vmatprep.subr.bf16.mxu1 %v1753_v16  ;;  %v1804_v57 = vld [vmem:[#allocation3 + $0xc4] ss:$8 sps:$4 sm:$0xff]   ;;  %v1806_v59 = vld [vmem:[#allocation3 + $0xc0] ss:$8 sps:$4 sm:$0xff]   ;;  %v1809_v61 = vld [vmem:[#allocation3 + $0xd4] ss:$8 sps:$4 sm:$0xff]  }
  0x49   :  { %v1811_v62 = vld [vmem:[#allocation3 + $0x10] ss:$8 sps:$4 sm:$0xff]   ;;  %v1813_v0 = vld [vmem:[#allocation3 + $0x24] ss:$8 sps:$4 sm:$0xff]   ;;  %v1818_v3 = vld [vmem:[#allocation3 + $0xe0] ss:$8 sps:$4 sm:$0xff]  }
  0x4a   :  { %1675 = vmatpush3.bf16.msra.mxu0 %v1752_v15  ;;  %v1812_v63 = vld [vmem:[#allocation3 + $0xd0] ss:$8 sps:$4 sm:$0xff]  }
  0x4b   :  { %1725 = vmatpush3.bf16.msra.mxu1 %v1754_v17  ;;  %1676 = vmatprep.subr.bf16.mxu0 %v1755_v18  ;;  %v1823_v6 = vld [vmem:[#allocation3 + $0x30] ss:$8 sps:$4 sm:$0xff]  }
  0x4c   :  { %1718 = vmatprep.subr.bf16.mxu1 %v1756_v19 }
  0x4e   :  { %1677 = vmatpush3.bf16.msra.mxu0 %v1755_v18 }
  0x4f   :  { %1726 = vmatpush3.bf16.msra.mxu1 %v1757_v20  ;;  %1678 = vmatprep.subr.bf16.mxu0 %v1758_v21 }
  0x50   :  { %1719 = vmatprep.subr.bf16.mxu1 %v1759_v23 }
  0x52   :  { %1679 = vmatpush3.bf16.msra.mxu0 %v1758_v21 }
  0x53   :  { %1727 = vmatpush3.bf16.msra.mxu1 %v1760_v25  ;;  %1552 = vmatprep.subr.bf16.mxu0 %v1738_v1  ;;  %v1815_v1 = vld [vmem:[#allocation3 + $0xe4] ss:$8 sps:$4 sm:$0xff]  }
  0x55   :  { %1681 = vmatmul.mubr.bf16.vlgmr.msra.gmra.mxu0 %v1765_v27 }
  0x56   :  { %890 = vmatmul.mubr.bf16.vlgmr.msra.gmra.mxu1 %v1762_v26  ;;  %1553 = vmatpush3.bf16.msra.mxu0 %v1993_v2  ;;  %v1817_v2 = vld [vmem:[#allocation3 + $0x20] ss:$8 sps:$4 sm:$0xff]  }
  0x57   :  { %1684 = vmatprep.mubr.bf16.mxu0 %v1766_v28  ;;  %897 = vmatprep.mubr.bf16.mxu1 %v1767_v29 }
  0x58   :  { %1554 = vmatprep.subr.bf16.mxu0 %v1741_v4  ;;  %v1819_v4 = vld [vmem:[#allocation3 + $0x34] ss:$8 sps:$4 sm:$0xff]  }
  0x5a   :  { %1555 = vmatpush3.bf16.msra.mxu0 %v1742_v5  ;;  %v1821_v5 = vld [vmem:[#allocation3 + $0xf4] ss:$8 sps:$4 sm:$0xff]  }
  0x5b   :  { %1556 = vmatprep.subr.bf16.mxu0 %v1744_v7  ;;  %v1824_v7 = vld [vmem:[#allocation3 + $0xf0] ss:$8 sps:$4 sm:$0xff]  }
  0x5d   :  { %1685 = vmatmul.mubr.bf16.gmra.mxu0 %v1769_v30 }
  0x5e   :  { %898 = vmatmul.mubr.bf16.gmra.mxu1 %v1770_v31  ;;  %1688 = vmatprep.mubr.bf16.mxu0 %v1771_v32 }
  0x5f   :  { %905 = vmatprep.mubr.bf16.mxu1 %v1772_v33  ;;  %1557 = vmatpush3.bf16.msra.mxu0 %v1996_v8 }
  0x60   :  { %1558 = vmatprep.subr.bf16.mxu0 %v1747_v10 }
  0x63   :  { %1559 = vmatpush3.bf16.msra.mxu0 %v1998_v11 }
  0x64   :  { %1560 = vmatprep.subr.bf16.mxu0 %v1750_v13 }
  0x65   :  { %1689 = vmatmul.mubr.bf16.gmra.mxu0 %v1774_v34 }
  0x66   :  { %906 = vmatmul.mubr.bf16.gmra.mxu1 %v1775_v35  ;;  %1692 = vmatprep.mubr.bf16.mxu0 %v1776_v36 }
  0x67   :  { %913 = vmatprep.mubr.bf16.mxu1 %v1777_v37  ;;  %1561 = vmatpush3.bf16.msra.mxu0 %v2001_v14 }
  0x68   :  { %1562 = vmatprep.subr.bf16.mxu0 %v1753_v16  ;;  %v2020_v16 = vld [vmem:[%s2098_s4] ss:$0 sm:$0xff]  ;;  %s1941_s4 = smov [#allocation11]  }
  0x69   :  { %s1282_s15 = sshll.u32 %s1941_s4, 4  ;;  %s1283_s15 = int_to_ptr.vmem [resolvable:$true] %s1282_s15 }
  0x6a   :  { %s1905_s16 = scalar_lea.vmem %s1283_s15, 2048  ;;  %p1910_p7 = scmp.lt.s32.totalorder %s1283_s15, %s1283_s15 }
  0x6b   :  { %1563 = vmatpush3.bf16.msra.mxu0 %v1754_v17  ;;  %p1906_p6 = scmp.ne.s32.totalorder %s1283_s15, %s1905_s16  ;;  %p1911_p8 = scmp.lt.s32.totalorder %s1905_s16, %s1905_s16 }
  0x6c   :  { %1564 = vmatprep.subr.bf16.mxu0 %v1756_v19 }
  0x6d   :  { %1693 = vmatmul.mubr.bf16.gmra.mxu0 %v1779_v38  ;;  %p1912_p9 = por %p1911_p8, %p1910_p7 }
  0x6e   :  { %914 = vmatmul.mubr.bf16.gmra.mxu1 %v1780_v39  ;;  %1696 = vmatprep.mubr.bf16.mxu0 %v1781_v40 }
  0x6f   :  { %921 = vmatprep.mubr.bf16.mxu1 %v1782_v41  ;;  %1565 = vmatpush3.bf16.msra.mxu0 %v1757_v20  ;;  %p1913_p10 = pnand %p1912_p9, %p1906_p6 }
  0x70   :  { %1566 = vmatprep.subr.bf16.mxu0 %v1759_v23 }
  0x73   :  { %1567 = vmatpush3.bf16.msra.mxu0 %v1760_v25 }
  0x75   :  { %1697 = vmatmul.mubr.bf16.gmra.mxu0 %v1784_v42 }
  0x76   :  { %922 = vmatmul.mubr.bf16.gmra.mxu1 %v1785_v43  ;;  %1700 = vmatprep.mubr.bf16.mxu0 %v1786_v44 }
  0x77   :  { %929 = vmatprep.mubr.bf16.mxu1 %v1787_v45 }
  0x7d   :  { %1701 = vmatmul.mubr.bf16.gmra.mxu0 %v1789_v46 }
  0x7e   :  { %930 = vmatmul.mubr.bf16.gmra.mxu1 %v1790_v47  ;;  %1704 = vmatprep.mubr.bf16.mxu0 %v1791_v48 }
  0x7f   :  { %937 = vmatprep.mubr.bf16.mxu1 %v1792_v49 }
  0x85   :  { %1705 = vmatmul.mubr.bf16.gmra.mxu0 %v1794_v50 }
  0x86   :  { %938 = vmatmul.mubr.bf16.gmra.mxu1 %v1795_v51  ;;  %1708 = vmatprep.mubr.bf16.mxu0 %v1796_v52 }
  0x87   :  { %945 = vmatprep.mubr.bf16.mxu1 %v1797_v53 }
  0x8d   :  { %1709 = vmatmul.mubr.bf16.gmra.mxu0 %v1799_v54 }
  0x8e   :  { %946 = vmatmul.mubr.bf16.gmra.mxu1 %v1800_v55  ;;  %857 = vmatprep.mubr.bf16.mxu0 %v1803_v56 }
  0x8f   :  { %953 = vmatprep.mubr.bf16.mxu1 %v1804_v57 }
  0x95   :  { %858 = vmatmul.mubr.bf16.vlgmr.msra.gmra.mxu0 %v1801_v58 }
  0x96   :  { %954 = vmatmul.mubr.bf16.gmra.mxu1 %v1806_v59  ;;  %865 = vmatprep.mubr.bf16.mxu0 %v1807_v60 }
  0x97   :  { %961 = vmatprep.mubr.bf16.mxu1 %v1809_v61 }
  0x9d   :  { %866 = vmatmul.mubr.bf16.gmra.mxu0 %v1811_v62 }
  0x9e   :  { %962 = vmatmul.mubr.bf16.gmra.mxu1 %v1812_v63  ;;  %873 = vmatprep.mubr.bf16.mxu0 %v1813_v0 }
  0x9f   :  { %969 = vmatprep.mubr.bf16.mxu1 %v1815_v1 }
  0xa5   :  { %874 = vmatmul.mubr.bf16.gmra.mxu0 %v1817_v2 }
  0xa6   :  { %970 = vmatmul.mubr.bf16.gmra.mxu1 %v1818_v3  ;;  %881 = vmatprep.mubr.bf16.mxu0 %v1819_v4 }
  0xa7   :  { %977 = vmatprep.mubr.bf16.mxu1 %v1821_v5 }
  0xad   :  { %882 = vmatmul.mubr.bf16.gmra.mxu0 %v1823_v6 }
  0xae   :  { %978 = vmatmul.mubr.bf16.gmra.mxu1 %v1824_v7 }
 0x115   :  { %v2009_v8 = vpop.f32.mrf.mxu0 }
 0x116   :  { %v1592_v9 = vpop.f32.mrf.mxu1 }
 0x117   :  { %v2011_v10 = vpop.f32.mrf.mxu0 }
 0x118   :  { %v1593_v11 = vpop.f32.mrf.mxu1 }
 0x119   :  { %v2013_v12 = vpop.f32.mrf.mxu0  ;;  %v1594_v37 = vadd.f32 %v1593_v11, %v1592_v9 }
 0x11a   :  { %v1595_v13 = vpop.f32.mrf.mxu1 }
 0x11b   :  { %v2015_v14 = vpop.f32.mrf.mxu0 }
 0x11c   :  { %v1596_v15 = vpop.f32.mrf.mxu1 }
 0x11d   :  { %v1686_v17 = vpop.f32.mrf.mxu0  ;;  %v1597_v43 = vadd.f32 %v1596_v15, %v1595_v13 }
 0x11e   :  { %v2023_v18 = vadd.f32 %v1686_v17, %v2020_v16  ;;  %v1598_v19 = vpop.f32.mrf.mxu1 }
 0x11f   :  { %v330_v20 = vpop.f32.mrf.mxu0 }
 0x120   :  { %v2026_v21 = vadd.f32 %v2020_v16, %v330_v20  ;;  %v1599_v22 = vpop.f32.mrf.mxu1 }
 0x121   :  { %v1687_v23 = vpop.f32.mrf.mxu0  ;;  %v1600_v33 = vadd.f32 %v1599_v22, %v1598_v19 }
 0x122   :  { %v2029_v24 = vadd.f32 %v1687_v23, %v2020_v16  ;;  %v1601_v25 = vpop.f32.mrf.mxu1 }
 0x123   :  { %v333_v26 = vpop.f32.mrf.mxu0 }
 0x124   :  { %v2032_v27 = vadd.f32 %v2020_v16, %v333_v26  ;;  %v1602_v28 = vpop.f32.mrf.mxu1 }
 0x125   :  { %v1690_v29 = vpop.f32.mrf.mxu0  ;;  %v1603_v38 = vadd.f32 %v1602_v28, %v1601_v25 }
 0x126   :  { %v355_v30 = vadd.f32 %v1690_v29, %v2020_v16  ;;  %v1604_v31 = vpop.f32.mrf.mxu1 }
 0x127   :  { %v346_v32 = vpop.f32.mrf.mxu0 }
 0x128   :  { %v347_v34 = vadd.f32 %v2020_v16, %v346_v32  ;;  %v1605_v35 = vpop.f32.mrf.mxu1  ;;  %v996_v39 = vadd.f32 %v1600_v33, %v355_v30 }
 0x129   :  { %v1691_v36 = vpop.f32.mrf.mxu0  ;;  %v1606_v61 = vadd.f32 %v1605_v35, %v1604_v31 }
 0x12a   :  { %v358_v40 = vadd.f32 %v1691_v36, %v2020_v16  ;;  %v1607_v41 = vpop.f32.mrf.mxu1  ;;  %v994_v44 = vadd.f32 %v1594_v37, %v347_v34  ;;  %v1095_v49 = vmax.f32 %v996_v39, 0.0 }
 0x12b   :  { %v349_v42 = vpop.f32.mrf.mxu0 }
 0x12c   :  { %v997_v45 = vadd.f32 %v1603_v38, %v358_v40  ;;  %v350_v46 = vadd.f32 %v2020_v16, %v349_v42  ;;  %v1608_v47 = vpop.f32.mrf.mxu1  ;;  %v1093_v54 = vmax.f32 %v994_v44, 0.0 }
 0x12d   :  { %v1694_v48 = vpop.f32.mrf.mxu0  ;;  %v1609_v2 = vadd.f32 %v1608_v47, %v1607_v41 }
 0x12e   :  { %v1096_v50 = vmax.f32 %v997_v45, 0.0  ;;  %v995_v51 = vadd.f32 %v1597_v43, %v350_v46  ;;  %v1610_v52 = vpop.f32.mrf.mxu1  ;;  %v371_v0 = vadd.f32 %v1694_v48, %v2020_v16 }
 0x12f   :  { %v362_v53 = vpop.f32.mrf.mxu0 }
 0x130   :  { %v1461_v55 = vpack.c.bf16 %v1096_v50, %v1095_v49  ;;  %v1094_v56 = vmax.f32 %v995_v51, 0.0  ;;  %v363_v57 = vadd.f32 %v2020_v16, %v362_v53  ;;  %v1611_v58 = vpop.f32.mrf.mxu1 }
 0x131   :  { %v1612_v59 = vadd.f32 %v1611_v58, %v1610_v52  ;;  %v1695_v60 = vpop.f32.mrf.mxu0 }
 0x132   :  { %1517 = vst [vmem:[#allocation11 + $0x28] sm:$0xff] %v1461_v55   ;;  %v1456_v62 = vpack.c.bf16 %v1094_v56, %v1093_v54  ;;  %v1613_v63 = vpop.f32.mrf.mxu1  ;;  %v998_v3 = vadd.f32 %v1606_v61, %v363_v57  ;;  %v374_v7 = vadd.f32 %v1695_v60, %v2020_v16 }
 0x133   :  { %v365_v1 = vpop.f32.mrf.mxu0  ;;  %v1000_v6 = vadd.f32 %v1612_v59, %v371_v0 }
 0x134   :  { %1516 = vst [vmem:[#allocation11 + $0x20] sm:$0xff] %v1456_v62   ;;  %v366_v4 = vadd.f32 %v2020_v16, %v365_v1  ;;  %v1614_v5 = vpop.f32.mrf.mxu1  ;;  %v1097_v20 = vmax.f32 %v998_v3, 0.0 }
 0x135   :  { %v1615_v9 = vadd.f32 %v1614_v5, %v1613_v63  ;;  %v1698_v11 = vpop.f32.mrf.mxu0  ;;  %v1099_v25 = vmax.f32 %v1000_v6, 0.0 }
 0x136   :  { %v999_v13 = vadd.f32 %v1609_v2, %v366_v4  ;;  %v1616_v15 = vpop.f32.mrf.mxu1  ;;  %v387_v49 = vadd.f32 %v1698_v11, %v2020_v16 }
 0x137   :  { %v1001_v17 = vadd.f32 %v1615_v9, %v374_v7  ;;  %v378_v19 = vpop.f32.mrf.mxu0 }
 0x138   :  { %v1098_v22 = vmax.f32 %v999_v13, 0.0  ;;  %v1617_v23 = vpop.f32.mrf.mxu1  ;;  %v379_v28 = vadd.f32 %v2020_v16, %v378_v19 }
 0x139   :  { %v1100_v26 = vmax.f32 %v1001_v17, 0.0  ;;  %v1618_v29 = vadd.f32 %v1617_v23, %v1616_v15  ;;  %v1699_v30 = vpop.f32.mrf.mxu0 }
 0x13a   :  { %v1466_v31 = vpack.c.bf16 %v1098_v22, %v1097_v20  ;;  %v1619_v32 = vpop.f32.mrf.mxu1  ;;  %v390_v53 = vadd.f32 %v1699_v30, %v2020_v16 }
 0x13b   :  { %v1471_v33 = vpack.c.bf16 %v1100_v26, %v1099_v25  ;;  %v381_v34 = vpop.f32.mrf.mxu0  ;;  %v1002_v37 = vadd.f32 %v1618_v29, %v379_v28 }
 0x13c   :  { %1518 = vst [vmem:[#allocation11 + $0x30] sm:$0xff] %v1466_v31   ;;  %v382_v35 = vadd.f32 %v2020_v16, %v381_v34  ;;  %v1620_v36 = vpop.f32.mrf.mxu1 }
 0x13d   :  { %1519 = vst [vmem:[#allocation11 + $0x38] sm:$0xff] %v1471_v33   ;;  %v1621_v38 = vadd.f32 %v1620_v36, %v1619_v32  ;;  %v1702_v39 = vpop.f32.mrf.mxu0  ;;  %v1101_v44 = vmax.f32 %v1002_v37, 0.0 }
 0x13e   :  { %v1622_v40 = vpop.f32.mrf.mxu1  ;;  %v403_v28 = vadd.f32 %v1702_v39, %v2020_v16  ;;  %v315_v39 = vadd.f32 %v2020_v16, %v2011_v10 }
 0x13f   :  { %v1003_v41 = vadd.f32 %v1621_v38, %v382_v35  ;;  %v394_v42 = vpop.f32.mrf.mxu0 }
 0x140   :  { %v1623_v43 = vpop.f32.mrf.mxu1  ;;  %v395_v2 = vadd.f32 %v2020_v16, %v394_v42 }
 0x141   :  { %v1102_v45 = vmax.f32 %v1003_v41, 0.0  ;;  %v1624_v46 = vadd.f32 %v1623_v43, %v1622_v40  ;;  %v1703_v47 = vpop.f32.mrf.mxu0 }
 0x142   :  { %v1625_v48 = vpop.f32.mrf.mxu1  ;;  %v406_v32 = vadd.f32 %v1703_v47, %v2020_v16 }
 0x143   :  { %v1476_v50 = vpack.c.bf16 %v1102_v45, %v1101_v44  ;;  %v397_v51 = vpop.f32.mrf.mxu0  ;;  %v1004_v54 = vadd.f32 %v1624_v46, %v387_v49 }
 0x144   :  { %v1626_v52 = vpop.f32.mrf.mxu1  ;;  %v398_v6 = vadd.f32 %v2020_v16, %v397_v51 }
 0x145   :  { %1520 = vst [vmem:[#allocation11 + $0x40] sm:$0xff] %v1476_v50   ;;  %v1627_v55 = vadd.f32 %v1626_v52, %v1625_v48  ;;  %v2046_v56 = vpop.f32.mrf.mxu0  ;;  %v1103_v61 = vmax.f32 %v1004_v54, 0.0  ;;  %v318_v50 = vadd.f32 %v2020_v16, %v2015_v14 }
 0x146   :  { %v1628_v57 = vpop.f32.mrf.mxu1 }
 0x147   :  { %v1005_v58 = vadd.f32 %v1627_v55, %v390_v53  ;;  %v410_v59 = vpop.f32.mrf.mxu0 }
 0x148   :  { %v1629_v60 = vpop.f32.mrf.mxu1  ;;  %v411_v48 = vadd.f32 %v2020_v16, %v410_v59 }
 0x149   :  { %v1104_v62 = vmax.f32 %v1005_v58, 0.0  ;;  %v1630_v63 = vadd.f32 %v1629_v60, %v1628_v57  ;;  %v2048_v0 = vpop.f32.mrf.mxu0 }
 0x14a   :  { %v1631_v1 = vpop.f32.mrf.mxu1 }
 0x14b   :  { %v1481_v3 = vpack.c.bf16 %v1104_v62, %v1103_v61  ;;  %v413_v4 = vpop.f32.mrf.mxu0  ;;  %v1006_v7 = vadd.f32 %v1630_v63, %v395_v2 }
 0x14c   :  { %v1632_v5 = vpop.f32.mrf.mxu1  ;;  %v414_v54 = vadd.f32 %v2020_v16, %v413_v4 }
 0x14d   :  { %1521 = vst [vmem:[#allocation11 + $0x48] sm:$0xff] %v1481_v3   ;;  %v1633_v9 = vadd.f32 %v1632_v5, %v1631_v1  ;;  %v2052_v11 = vpop.f32.mrf.mxu0  ;;  %v1105_v20 = vmax.f32 %v1006_v7, 0.0  ;;  %v323_v7 = vadd.f32 %v2009_v8, %v2020_v16 }
 0x14e   :  { %v1634_v13 = vpop.f32.mrf.mxu1 }
 0x14f   :  { %v1007_v15 = vadd.f32 %v1633_v9, %v398_v6  ;;  %v2054_v17 = vpop.f32.mrf.mxu0 }
 0x150   :  { %v1635_v19 = vpop.f32.mrf.mxu1 }
 0x151   :  { %v1106_v22 = vmax.f32 %v1007_v15, 0.0  ;;  %v1636_v23 = vadd.f32 %v1635_v19, %v1634_v13  ;;  %v2056_v25 = vpop.f32.mrf.mxu0  ;;  %v419_v13 = vadd.f32 %v2046_v56, %v2020_v16 }
 0x152   :  { %v1637_v26 = vpop.f32.mrf.mxu1 }
 0x153   :  { %v1486_v29 = vpack.c.bf16 %v1106_v22, %v1105_v20  ;;  %v2059_v30 = vpop.f32.mrf.mxu0  ;;  %v1008_v33 = vadd.f32 %v1636_v23, %v403_v28  ;;  %v326_v20 = vadd.f32 %v2013_v12, %v2020_v16  ;;  %v422_v28 = vadd.f32 %v2048_v0, %v2020_v16 }
 0x154   :  { %v1638_v31 = vpop.f32.mrf.mxu1  ;;  %v427_v0 = vadd.f32 %v2020_v16, %v2054_v17 }
 0x155   :  { %1522 = vst [vmem:[#allocation11 + $0x50] sm:$0xff] %v1486_v29   ;;  %v1639_v34 = vadd.f32 %v1638_v31, %v1637_v26  ;;  %v1568_v35 = vpop.f32.mrf.mxu0  ;;  %v1107_v42 = vmax.f32 %v1008_v33, 0.0 }
 0x156   :  { %v1640_v36 = vpop.f32.mrf.mxu1 }
 0x157   :  { %v1009_v37 = vadd.f32 %v1639_v34, %v406_v32  ;;  %v1569_v38 = vpop.f32.mrf.mxu0 }
 0x158   :  { %v1570_v40 = vadd.f32 %v1569_v38, %v1568_v35  ;;  %v1641_v41 = vpop.f32.mrf.mxu1 }
 0x159   :  { %v1108_v43 = vmax.f32 %v1009_v37, 0.0  ;;  %v1642_v44 = vadd.f32 %v1641_v41, %v1640_v36  ;;  %v1571_v45 = vpop.f32.mrf.mxu0 }
 0x15a   :  { %v1643_v46 = vpop.f32.mrf.mxu1  ;;  %v986_v51 = vadd.f32 %v1570_v40, %v315_v39 }
 0x15b   :  { %v1491_v47 = vpack.c.bf16 %v1108_v43, %v1107_v42  ;;  %v1572_v49 = vpop.f32.mrf.mxu0  ;;  %v1010_v55 = vadd.f32 %v1642_v44, %v411_v48 }
 0x15c   :  { %v1573_v52 = vadd.f32 %v1572_v49, %v1571_v45  ;;  %v1644_v53 = vpop.f32.mrf.mxu1  ;;  %v1085_v63 = vmax.f32 %v986_v51, 0.0  ;;  %v430_v49 = vadd.f32 %v2020_v16, %v2059_v30  ;;  %v435_v30 = vadd.f32 %v2052_v11, %v2020_v16 }
 0x15d   :  { %1523 = vst [vmem:[#allocation11 + $0x58] sm:$0xff] %v1491_v47   ;;  %v1645_v57 = vadd.f32 %v1644_v53, %v1643_v46  ;;  %v1574_v58 = vpop.f32.mrf.mxu0  ;;  %v1109_v3 = vmax.f32 %v1010_v55, 0.0 }
 0x15e   :  { %v987_v60 = vadd.f32 %v1573_v52, %v318_v50  ;;  %v1646_v61 = vpop.f32.mrf.mxu1 }
 0x15f   :  { %v1011_v10 = vadd.f32 %v1645_v57, %v414_v54  ;;  %v1575_v62 = vpop.f32.mrf.mxu0 }
 0x160   :  { %v1086_v59 = vmax.f32 %v987_v60, 0.0  ;;  %v1576_v1 = vadd.f32 %v1575_v62, %v1574_v58  ;;  %v1647_v2 = vpop.f32.mrf.mxu1 }
 0x161   :  { %v1110_v5 = vmax.f32 %v1011_v10, 0.0  ;;  %v1648_v14 = vadd.f32 %v1647_v2, %v1646_v61  ;;  %v1577_v6 = vpop.f32.mrf.mxu0 }
 0x162   :  { %v1436_v4 = vpack.c.bf16 %v1086_v59, %v1085_v63  ;;  %v1649_v9 = vpop.f32.mrf.mxu1  ;;  %v988_v22 = vadd.f32 %v1576_v1, %v323_v7 }
 0x163   :  { %v1496_v15 = vpack.c.bf16 %v1110_v5, %v1109_v3  ;;  %v1578_v19 = vpop.f32.mrf.mxu0  ;;  %v1012_v29 = vadd.f32 %v1648_v14, %v419_v13 }
 0x164   :  { %1437 = vst [vmem:[#allocation11] sm:$0xff] %v1436_v4   ;;  %v1579_v23 = vadd.f32 %v1578_v19, %v1577_v6  ;;  %v1650_v26 = vpop.f32.mrf.mxu1  ;;  %v1087_v35 = vmax.f32 %v988_v22, 0.0  ;;  %v438_v6 = vadd.f32 %v2056_v25, %v2020_v16 }
 0x165   :  { %1524 = vst [vmem:[#allocation11 + $0x60] sm:$0xff] %v1496_v15   ;;  %v1651_v8 = vadd.f32 %v1650_v26, %v1649_v9  ;;  %v1580_v31 = vpop.f32.mrf.mxu0  ;;  %v1111_v12 = vmax.f32 %v1012_v29, 0.0 }
 0x166   :  { %v989_v32 = vadd.f32 %v1579_v23, %v326_v20  ;;  %v1652_v33 = vpop.f32.mrf.mxu1 }
 0x167   :  { %v1013_v34 = vadd.f32 %v1651_v8, %v422_v28  ;;  %v1581_v56 = vpop.f32.mrf.mxu0 }
 0x168   :  { %v1088_v36 = vmax.f32 %v989_v32, 0.0  ;;  %v1582_v37 = vadd.f32 %v1581_v56, %v1580_v31  ;;  %v1653_v38 = vpop.f32.mrf.mxu1 }
 0x169   :  { %v1112_v40 = vmax.f32 %v1013_v34, 0.0  ;;  %v1654_v41 = vadd.f32 %v1653_v38, %v1652_v33  ;;  %v1583_v42 = vpop.f32.mrf.mxu0 }
 0x16a   :  { %v1441_v43 = vpack.c.bf16 %v1088_v36, %v1087_v35  ;;  %v1655_v44 = vpop.f32.mrf.mxu1  ;;  %v990_v46 = vadd.f32 %v1582_v37, %v2026_v21 }
 0x16b   :  { %v1501_v45 = vpack.c.bf16 %v1112_v40, %v1111_v12  ;;  %v1584_v39 = vpop.f32.mrf.mxu0  ;;  %v1014_v50 = vadd.f32 %v1654_v41, %v427_v0 }
 0x16c   :  { %1513 = vst [vmem:[#allocation11 + $0x8] sm:$0xff] %v1441_v43   ;;  %v1585_v48 = vadd.f32 %v1584_v39, %v1583_v42  ;;  %v1656_v47 = vpop.f32.mrf.mxu1  ;;  %v1089_v17 = vmax.f32 %v990_v46, 0.0 }
 0x16d   :  { %1525 = vst [vmem:[#allocation11 + $0x68] sm:$0xff] %v1501_v45   ;;  %v1657_v51 = vadd.f32 %v1656_v47, %v1655_v44  ;;  %v1586_v52 = vpop.f32.mrf.mxu0  ;;  %v1113_v10 = vmax.f32 %v1014_v50, 0.0 }
 0x16e   :  { %v991_v53 = vadd.f32 %v1585_v48, %v2032_v27  ;;  %v1658_v54 = vpop.f32.mrf.mxu1 }
 0x16f   :  { %v1015_v55 = vadd.f32 %v1657_v51, %v430_v49  ;;  %v1587_v57 = vpop.f32.mrf.mxu0 }
 0x170   :  { %v1090_v58 = vmax.f32 %v991_v53, 0.0  ;;  %v1588_v60 = vadd.f32 %v1587_v57, %v1586_v52  ;;  %v1659_v61 = vpop.f32.mrf.mxu1 }
 0x171   :  { %v1114_v21 = vmax.f32 %v1015_v55, 0.0  ;;  %v1660_v62 = vadd.f32 %v1659_v61, %v1658_v54  ;;  %v1589_v63 = vpop.f32.mrf.mxu0 }
 0x172   :  { %v1446_v59 = vpack.c.bf16 %v1090_v58, %v1089_v17  ;;  %v1661_v1 = vpop.f32.mrf.mxu1  ;;  %v992_v27 = vadd.f32 %v1588_v60, %v2023_v18 }
 0x173   :  { %v1506_v2 = vpack.c.bf16 %v1114_v21, %v1113_v10  ;;  %v1590_v3 = vpop.f32.mrf.mxu0  ;;  %v1016_v7 = vadd.f32 %v1660_v62, %v435_v30 }
 0x174   :  { %1514 = vst [vmem:[#allocation11 + $0x10] sm:$0xff] %v1446_v59   ;;  %v1591_v5 = vadd.f32 %v1590_v3, %v1589_v63  ;;  %v1662_v14 = vpop.f32.mrf.mxu1  ;;  %v1091_v15 = vmax.f32 %v992_v27, 0.0 }
 0x175   :  { %1526 = vst [vmem:[#allocation11 + $0x70] sm:$0xff] %v1506_v2   ;;  %v1663_v4 = vadd.f32 %v1662_v14, %v1661_v1  ;;  %v1115_v11 = vmax.f32 %v1016_v7, 0.0 }
 0x176   :  { %v993_v9 = vadd.f32 %v1591_v5, %v2029_v24 }
 0x177   :  { %v1017_v13 = vadd.f32 %v1663_v4, %v438_v6 }
 0x178   :  { %v1092_v19 = vmax.f32 %v993_v9, 0.0 }
 0x179   :  { %v1116_v20 = vmax.f32 %v1017_v13, 0.0 }
 0x17a   :  { %v1451_v22 = vpack.c.bf16 %v1092_v19, %v1091_v15 }
 0x17b   :  { %v1511_v23 = vpack.c.bf16 %v1116_v20, %v1115_v11 }
 0x17c   :  { %1515 = vst [vmem:[#allocation11 + $0x18] sm:$0xff] %v1451_v22  }
 0x17d   :  { %1527 = vst [vmem:[#allocation11 + $0x78] sm:$0xff] %v1511_v23  }
 0x17e   :  { %1916 = shalt.err (!%p1913_p10)
}
 0x17f   :  { %1288 = dma.vmem_to_hbm [thread:$0]  %s1283_s15, 2048, %s2099_s5, [#allocation5], %s1934_s21, %s1934_s21, %s1935_s22  }
 0x180   :  { %1931 = dma.done.wait [#allocation5], 2048  }
 0x181   :  { %1932 = vsyncadd [#allocation5], 4294965248 }
 0x182   :  { %1292 = vsyncpa [#allocation4], 1 }
 0x183   :  { %1293 = vsyncpa [#allocation7], 1 }
 0x184   :  { %1294 = vsyncpa [#allocation10], 1 }
 0x185   :  { %1295 = vsyncpa [#allocation5], 1 }

</bundles_post_ra>
